<compile_context>
chip_gen: v6e
topology: v6e:2x2x1
jax: 0.10.0
libtpu: 0.0.40
codegen_flags: <defaults>
</compile_context>

<pallas_src>
import functools

import jax
import jax.numpy as jnp
from jax.experimental import pallas as pl
from jax.experimental.pallas import tpu as pltpu


_HEAD_HIDDEN = 128   # fc_advt[0] / fc_v[0] output width (fixed by the module)
_HEAD_PAD = 128      # per-head lane padding for the fused head layer-2 output


def _q_net_kernel(
    x_ref,
    w1_ref, b1_ref,        # fc[0]  : n_in -> 128
    w2_ref, b2_ref,        # fc[2]  : 128  -> 128
    w3_ref, b3_ref,        # fc[4]  : 128  -> n_mid
    wh1_ref, bh1_ref,      # fused head layer-1 : n_mid -> 256  ([advt | v])
    wh2_ref, bh2_ref,      # fused head layer-2 : 256 -> 256 block-diag, padded
    out_ref,
    *, n_out, mm_dtype,
):
    def mm(a, w_ref):
        # bf16 (or f32) operands, f32 accumulation on the MXU.
        return jnp.dot(a.astype(mm_dtype), w_ref[...],
                       preferred_element_type=jnp.float32)

    x = x_ref[...]

    # --- fc trunk: Linear -> ReLU -> Linear -> ReLU -> Linear ---
    h = jnp.maximum(mm(x, w1_ref) + b1_ref[...], 0.0)
    h = jnp.maximum(mm(h, w2_ref) + b2_ref[...], 0.0)
    feat = mm(h, w3_ref) + b3_ref[...]

    # --- fused heads: one (n_mid,256) dot, ReLU, one (256,256) block-diag dot ---
    heads = jnp.maximum(mm(feat, wh1_ref) + bh1_ref[...], 0.0)   # (tb, 256)
    out2 = mm(heads, wh2_ref) + bh2_ref[...]                     # (tb, 256)

    adv = out2[:, :_HEAD_PAD]      # [advantage(n_out) | exact zeros]
    val = out2[:, _HEAD_PAD:]      # [value(n_out)     | exact zeros]

    # Padded advantage columns are exact zeros, so summing 128 lanes and
    # dividing by n_out gives the mean over the real n_out columns.
    adv_mean = jnp.sum(adv, axis=1, keepdims=True) * (1.0 / n_out)

    # Dueling combine, stored lane-dense (width 128); wrapper slices [:n_out].
    out_ref[...] = val + adv - adv_mean


def _uniform_init(key, shape, fan_in):
    # PyTorch nn.Linear default init: U(-1/sqrt(fan_in), 1/sqrt(fan_in))
    bound = 1.0 / jnp.sqrt(jnp.float32(fan_in))
    return jax.random.uniform(key, shape, jnp.float32, -bound, bound)


def init_q_net_params(key, n_in, n_mid=128, n_out=20):
    """Deterministic parameter init. Weights are (in, out); biases are (1, out)."""
    dims = [
        (n_in, 128),            # fc[0]
        (128, 128),             # fc[2]
        (128, n_mid),           # fc[4]
        (n_mid, _HEAD_HIDDEN),  # fc_advt[0]
        (_HEAD_HIDDEN, n_out),  # fc_advt[2]
        (n_mid, _HEAD_HIDDEN),  # fc_v[0]
        (_HEAD_HIDDEN, n_out),  # fc_v[2]
    ]
    params = []
    keys = jax.random.split(key, 2 * len(dims))
    for i, (din, dout) in enumerate(dims):
        w = _uniform_init(keys[2 * i], (din, dout), din)
        b = _uniform_init(keys[2 * i + 1], (1, dout), din)
        params.append((w, b))
    return params


def _fuse_params(params, n_out, mm_dtype):
    """Build the fused / block-diagonal head weights (done once, in JAX)."""
    (w1, b1), (w2, b2), (w3, b3), (wa1, ba1), (wa2, ba2), (wv1, bv1), (wv2, bv2) = params
    H, P = _HEAD_HIDDEN, _HEAD_PAD

    # Head layer-1: concat along the output dim -> one N=256 matmul.
    wh1 = jnp.concatenate([wa1, wv1], axis=1)          # (n_mid, 256)
    bh1 = jnp.concatenate([ba1, bv1], axis=1)          # (1, 256)

    # Head layer-2: block-diagonal, each block lane-padded to 128 columns.
    wh2 = jnp.zeros((2 * H, 2 * P), jnp.float32)
    wh2 = wh2.at[:H, :n_out].set(wa2).at[H:, P:P + n_out].set(wv2)
    bh2 = jnp.zeros((1, 2 * P), jnp.float32)
    bh2 = bh2.at[0, :n_out].set(ba2[0]).at[0, P:P + n_out].set(bv2[0])

    fused = [(w1, b1), (w2, b2), (w3, b3), (wh1, bh1), (wh2, bh2)]
    # Matmul operands in mm_dtype (bf16 halves weight DMA bytes); biases stay f32.
    return [(w.astype(mm_dtype), b.astype(jnp.float32)) for w, b in fused]


def q_net_forward(state, params, *, mm_dtype=jnp.bfloat16, batch_tile=256):
    """Pallas forward. state: (B, n_in) or (n_in,) float32. Returns (B,8),(B,n_out-8)."""
    if state.ndim == 1:
        state = state[None]
    state = state.astype(jnp.float32)
    B, n_in = state.shape
    n_out = params[4][0].shape[1]   # fc_advt[2] out_features
    assert n_out <= _HEAD_PAD

    fused = _fuse_params(params, n_out, mm_dtype)

    # Batch tiling: one full-array block for small B, 256-row tiles otherwise.
    tb = batch_tile if B >= batch_tile else B
    n_tiles = pl.cdiv(B, tb)
    b_pad = n_tiles * tb
    if b_pad != B:
        state = jnp.pad(state, ((0, b_pad - B), (0, 0)))

    def resident(shape):
        # Weight/bias blocks map to (0, 0) every step -> loaded once, VMEM-resident.
        return pl.BlockSpec(shape, lambda i: (0, 0))

    in_specs = [pl.BlockSpec((tb, n_in), lambda i: (i, 0))]
    flat_args = [state]
    for w, b in fused:
        in_specs.append(resident(w.shape))
        in_specs.append(resident(b.shape))
        flat_args += [w, b]

    q_pad = pl.pallas_call(
        functools.partial(_q_net_kernel, n_out=n_out, mm_dtype=mm_dtype),
        out_shape=jax.ShapeDtypeStruct((b_pad, _HEAD_PAD), jnp.float32),
        grid=(n_tiles,),
        in_specs=in_specs,
        out_specs=pl.BlockSpec((tb, _HEAD_PAD), lambda i: (i, 0)),
        compiler_params=pltpu.CompilerParams(
            dimension_semantics=("parallel",)),
    )(*flat_args)

    q = q_pad[:B, :n_out]
    return q[:, :8], q[:, 8:]


def q_net_reference(state, params):
    """Pure-JAX f32 reference for correctness checking."""
    if state.ndim == 1:
        state = state[None]
    (w1, b1), (w2, b2), (w3, b3), (wa1, ba1), (wa2, ba2), (wv1, bv1), (wv2, bv2) = params
    h = jnp.maximum(state @ w1 + b1, 0.0)
    h = jnp.maximum(h @ w2 + b2, 0.0)
    feat = h @ w3 + b3
    adv = jnp.maximum(feat @ wa1 + ba1, 0.0) @ wa2 + ba2
    val = jnp.maximum(feat @ wv1 + bv1, 0.0) @ wv2 + bv2
    q = val + adv - jnp.mean(adv, axis=1, keepdims=True)
    return q[:, :8], q[:, 8:]


if __name__ == "__main__":
    key = jax.random.PRNGKey(0)
    k_param, k_x, k_xb = jax.random.split(key, 3)

    n_in, n_mid, n_out = 32, 128, 20
    params = init_q_net_params(k_param, n_in, n_mid, n_out)

    # 1) Small batch, f32 matmul operands -> bit-accurate path, strict check.
    x = jax.random.normal(k_x, (2, n_in), jnp.float32)
    out_a, out_b = q_net_forward(x, params, mm_dtype=jnp.float32)
    jax.block_until_ready((out_a, out_b))
    ref_a, ref_b = q_net_reference(x, params)
    assert out_a.shape == (2, 8) and out_b.shape == (2, n_out - 8)
    assert jnp.allclose(out_a, ref_a, atol=1e-5, rtol=1e-5)
    assert jnp.allclose(out_b, ref_b, atol=1e-5, rtol=1e-5)

    # 2) Same batch, default bf16 matmul operands (MXU-native) -> loose check.
    out_a, out_b = q_net_forward(x, params)
    jax.block_until_ready((out_a, out_b))
    assert jnp.allclose(out_a, ref_a, atol=5e-2, rtol=5e-2)
    assert jnp.allclose(out_b, ref_b, atol=5e-2, rtol=5e-2)

    # 3) Larger, non-multiple batch exercises the batch grid + padding path.
    xb = jax.random.normal(k_xb, (300, n_in), jnp.float32)
    out_a, out_b = q_net_forward(xb, params)
    jax.block_until_ready((out_a, out_b))
    ref_a, ref_b = q_net_reference(xb, params)
    assert out_a.shape == (300, 8) and out_b.shape == (300, n_out - 8)
    assert jnp.allclose(out_a, ref_a, atol=5e-2, rtol=5e-2)
    assert jnp.allclose(out_b, ref_b, atol=5e-2, rtol=5e-2)

    print("KERNEL_OK")
</pallas_src>

<mosaic_0001>
module attributes {stable_mosaic.version = 11 : i64} {
  func.func @_q_net_kernel(%arg0: i32, %arg1: memref<2x32xf32, #tpu.memory_space<vmem>>, %arg2: memref<32x128xf32, #tpu.memory_space<vmem>>, %arg3: memref<1x128xf32, #tpu.memory_space<vmem>>, %arg4: memref<128x128xf32, #tpu.memory_space<vmem>>, %arg5: memref<1x128xf32, #tpu.memory_space<vmem>>, %arg6: memref<128x128xf32, #tpu.memory_space<vmem>>, %arg7: memref<1x128xf32, #tpu.memory_space<vmem>>, %arg8: memref<128x256xf32, #tpu.memory_space<vmem>>, %arg9: memref<1x256xf32, #tpu.memory_space<vmem>>, %arg10: memref<256x256xf32, #tpu.memory_space<vmem>>, %arg11: memref<1x256xf32, #tpu.memory_space<vmem>>, %arg12: memref<2x128xf32, #tpu.memory_space<vmem>>) attributes {dimension_semantics = [#tpu.dimension_semantics<parallel>], iteration_bounds = array<i64: 1>, scalar_prefetch = 0 : i64, scratch_operands = 0 : i64, tpu.core_type = #tpu.core_type<tc>, window_params = [{transform_indices = @transform_0, window_bounds = array<i64: 2, 32>}, {pipeline_mode = #tpu.pipeline_mode<synchronous>, transform_indices = @transform_1, window_bounds = array<i64: 32, 128>}, {pipeline_mode = #tpu.pipeline_mode<synchronous>, transform_indices = @transform_2, window_bounds = array<i64: 1, 128>}, {pipeline_mode = #tpu.pipeline_mode<synchronous>, transform_indices = @transform_3, window_bounds = array<i64: 128, 128>}, {pipeline_mode = #tpu.pipeline_mode<synchronous>, transform_indices = @transform_4, window_bounds = array<i64: 1, 128>}, {pipeline_mode = #tpu.pipeline_mode<synchronous>, transform_indices = @transform_5, window_bounds = array<i64: 128, 128>}, {pipeline_mode = #tpu.pipeline_mode<synchronous>, transform_indices = @transform_6, window_bounds = array<i64: 1, 128>}, {pipeline_mode = #tpu.pipeline_mode<synchronous>, transform_indices = @transform_7, window_bounds = array<i64: 128, 256>}, {pipeline_mode = #tpu.pipeline_mode<synchronous>, transform_indices = @transform_8, window_bounds = array<i64: 1, 256>}, {pipeline_mode = #tpu.pipeline_mode<synchronous>, transform_indices = @transform_9, window_bounds = array<i64: 256, 256>}, {pipeline_mode = #tpu.pipeline_mode<synchronous>, transform_indices = @transform_10, window_bounds = array<i64: 1, 256>}, {transform_indices = @transform_11, window_bounds = array<i64: 2, 128>}]} {
    %c0 = arith.constant 0 : index
    %c0_0 = arith.constant 0 : index
    %0 = vector.load %arg1[%c0, %c0_0] : memref<2x32xf32, #tpu.memory_space<vmem>>, vector<2x32xf32>
    %c0_1 = arith.constant 0 : index
    %c0_2 = arith.constant 0 : index
    %1 = vector.load %arg2[%c0_1, %c0_2] : memref<32x128xf32, #tpu.memory_space<vmem>>, vector<32x128xf32>
    %cst = arith.constant dense<0.000000e+00> : vector<2x128xf32>
    %2 = tpu.matmul %0, %1, %cst {dimension_numbers = #tpu.dot_dimension_numbers<[1], [0], [0], [1], [0, 0, 1, 1], [], []>} : vector<2x32xf32>, vector<32x128xf32>, vector<2x128xf32> -> vector<2x128xf32>
    %c0_3 = arith.constant 0 : index
    %c0_4 = arith.constant 0 : index
    %3 = vector.load %arg3[%c0_3, %c0_4] : memref<1x128xf32, #tpu.memory_space<vmem>>, vector<1x128xf32>
    %4 = vector.broadcast %3 : vector<1x128xf32> to vector<2x128xf32>
    %5 = arith.addf %2, %4 : vector<2x128xf32>
    %cst_5 = arith.constant 0.000000e+00 : f32
    %6 = vector.broadcast %cst_5 : f32 to vector<2x128xf32>
    %7 = arith.maximumf %5, %6 : vector<2x128xf32>
    %c0_6 = arith.constant 0 : index
    %c0_7 = arith.constant 0 : index
    %8 = vector.load %arg4[%c0_6, %c0_7] : memref<128x128xf32, #tpu.memory_space<vmem>>, vector<128x128xf32>
    %cst_8 = arith.constant dense<0.000000e+00> : vector<2x128xf32>
    %9 = tpu.matmul %7, %8, %cst_8 {dimension_numbers = #tpu.dot_dimension_numbers<[1], [0], [0], [1], [0, 0, 1, 1], [], []>} : vector<2x128xf32>, vector<128x128xf32>, vector<2x128xf32> -> vector<2x128xf32>
    %c0_9 = arith.constant 0 : index
    %c0_10 = arith.constant 0 : index
    %10 = vector.load %arg5[%c0_9, %c0_10] : memref<1x128xf32, #tpu.memory_space<vmem>>, vector<1x128xf32>
    %11 = vector.broadcast %10 : vector<1x128xf32> to vector<2x128xf32>
    %12 = arith.addf %9, %11 : vector<2x128xf32>
    %cst_11 = arith.constant 0.000000e+00 : f32
    %13 = vector.broadcast %cst_11 : f32 to vector<2x128xf32>
    %14 = arith.maximumf %12, %13 : vector<2x128xf32>
    %c0_12 = arith.constant 0 : index
    %c0_13 = arith.constant 0 : index
    %15 = vector.load %arg6[%c0_12, %c0_13] : memref<128x128xf32, #tpu.memory_space<vmem>>, vector<128x128xf32>
    %cst_14 = arith.constant dense<0.000000e+00> : vector<2x128xf32>
    %16 = tpu.matmul %14, %15, %cst_14 {dimension_numbers = #tpu.dot_dimension_numbers<[1], [0], [0], [1], [0, 0, 1, 1], [], []>} : vector<2x128xf32>, vector<128x128xf32>, vector<2x128xf32> -> vector<2x128xf32>
    %c0_15 = arith.constant 0 : index
    %c0_16 = arith.constant 0 : index
    %17 = vector.load %arg7[%c0_15, %c0_16] : memref<1x128xf32, #tpu.memory_space<vmem>>, vector<1x128xf32>
    %18 = vector.broadcast %17 : vector<1x128xf32> to vector<2x128xf32>
    %19 = arith.addf %16, %18 : vector<2x128xf32>
    %c0_17 = arith.constant 0 : index
    %c0_18 = arith.constant 0 : index
    %20 = vector.load %arg8[%c0_17, %c0_18] : memref<128x256xf32, #tpu.memory_space<vmem>>, vector<128x256xf32>
    %cst_19 = arith.constant dense<0.000000e+00> : vector<2x256xf32>
    %21 = tpu.matmul %19, %20, %cst_19 {dimension_numbers = #tpu.dot_dimension_numbers<[1], [0], [0], [1], [0, 0, 1, 1], [], []>} : vector<2x128xf32>, vector<128x256xf32>, vector<2x256xf32> -> vector<2x256xf32>
    %c0_20 = arith.constant 0 : index
    %c0_21 = arith.constant 0 : index
    %22 = vector.load %arg9[%c0_20, %c0_21] : memref<1x256xf32, #tpu.memory_space<vmem>>, vector<1x256xf32>
    %23 = vector.broadcast %22 : vector<1x256xf32> to vector<2x256xf32>
    %24 = arith.addf %21, %23 : vector<2x256xf32>
    %cst_22 = arith.constant 0.000000e+00 : f32
    %25 = vector.broadcast %cst_22 : f32 to vector<2x256xf32>
    %26 = arith.maximumf %24, %25 : vector<2x256xf32>
    %c0_23 = arith.constant 0 : index
    %c0_24 = arith.constant 0 : index
    %27 = vector.load %arg10[%c0_23, %c0_24] : memref<256x256xf32, #tpu.memory_space<vmem>>, vector<256x256xf32>
    %cst_25 = arith.constant dense<0.000000e+00> : vector<2x256xf32>
    %28 = tpu.matmul %26, %27, %cst_25 {dimension_numbers = #tpu.dot_dimension_numbers<[1], [0], [0], [1], [0, 0, 1, 1], [], []>} : vector<2x256xf32>, vector<256x256xf32>, vector<2x256xf32> -> vector<2x256xf32>
    %c0_26 = arith.constant 0 : index
    %c0_27 = arith.constant 0 : index
    %29 = vector.load %arg11[%c0_26, %c0_27] : memref<1x256xf32, #tpu.memory_space<vmem>>, vector<1x256xf32>
    %30 = vector.broadcast %29 : vector<1x256xf32> to vector<2x256xf32>
    %31 = arith.addf %28, %30 : vector<2x256xf32>
    %32 = vector.extract_strided_slice %31 {offsets = [0, 0], sizes = [2, 128], strides = [1, 1]} : vector<2x256xf32> to vector<2x128xf32>
    %33 = vector.extract_strided_slice %31 {offsets = [0, 128], sizes = [2, 128], strides = [1, 1]} : vector<2x256xf32> to vector<2x128xf32>
    %cst_28 = arith.constant dense<0.000000e+00> : vector<2xf32>
    %34 = vector.multi_reduction <add>, %32, %cst_28 [1] : vector<2x128xf32> to vector<2xf32>
    %35 = vector.shape_cast %34 : vector<2xf32> to vector<2x1xf32>
    %cst_29 = arith.constant 5.000000e-02 : f32
    %36 = vector.broadcast %cst_29 : f32 to vector<2x1xf32>
    %37 = arith.mulf %35, %36 : vector<2x1xf32>
    %38 = arith.addf %33, %32 : vector<2x128xf32>
    %39 = vector.broadcast %37 : vector<2x1xf32> to vector<2x128xf32>
    %40 = arith.subf %38, %39 : vector<2x128xf32>
    %c0_30 = arith.constant 0 : index
    %c0_31 = arith.constant 0 : index
    %41 = vector.load %arg12[%c0_30, %c0_31] : memref<2x128xf32, #tpu.memory_space<vmem>>, vector<2x128xf32>
    tpu.vector_store %arg12[%c0_30, %c0_31], %40 {strides = array<i32>} : memref<2x128xf32, #tpu.memory_space<vmem>>, vector<2x128xf32>,
    return
  }
  func.func @transform_0(%arg0: i32) -> (i32, i32) {
    %c0_i32 = arith.constant 0 : i32
    %c0_i32_0 = arith.constant 0 : i32
    return %arg0, %c0_i32 : i32, i32
  }
  func.func @transform_1(%arg0: i32) -> (i32, i32) {
    %c0_i32 = arith.constant 0 : i32
    %c0_i32_0 = arith.constant 0 : i32
    %c0_i32_1 = arith.constant 0 : i32
    return %c0_i32, %c0_i32_0 : i32, i32
  }
  func.func @transform_2(%arg0: i32) -> (i32, i32) {
    %c0_i32 = arith.constant 0 : i32
    %c0_i32_0 = arith.constant 0 : i32
    %c0_i32_1 = arith.constant 0 : i32
    return %c0_i32, %c0_i32_0 : i32, i32
  }
  func.func @transform_3(%arg0: i32) -> (i32, i32) {
    %c0_i32 = arith.constant 0 : i32
    %c0_i32_0 = arith.constant 0 : i32
    %c0_i32_1 = arith.constant 0 : i32
    return %c0_i32, %c0_i32_0 : i32, i32
  }
  func.func @transform_4(%arg0: i32) -> (i32, i32) {
    %c0_i32 = arith.constant 0 : i32
    %c0_i32_0 = arith.constant 0 : i32
    %c0_i32_1 = arith.constant 0 : i32
    return %c0_i32, %c0_i32_0 : i32, i32
  }
  func.func @transform_5(%arg0: i32) -> (i32, i32) {
    %c0_i32 = arith.constant 0 : i32
    %c0_i32_0 = arith.constant 0 : i32
    %c0_i32_1 = arith.constant 0 : i32
    return %c0_i32, %c0_i32_0 : i32, i32
  }
  func.func @transform_6(%arg0: i32) -> (i32, i32) {
    %c0_i32 = arith.constant 0 : i32
    %c0_i32_0 = arith.constant 0 : i32
    %c0_i32_1 = arith.constant 0 : i32
    return %c0_i32, %c0_i32_0 : i32, i32
  }
  func.func @transform_7(%arg0: i32) -> (i32, i32) {
    %c0_i32 = arith.constant 0 : i32
    %c0_i32_0 = arith.constant 0 : i32
    %c0_i32_1 = arith.constant 0 : i32
    return %c0_i32, %c0_i32_0 : i32, i32
  }
  func.func @transform_8(%arg0: i32) -> (i32, i32) {
    %c0_i32 = arith.constant 0 : i32
    %c0_i32_0 = arith.constant 0 : i32
    %c0_i32_1 = arith.constant 0 : i32
    return %c0_i32, %c0_i32_0 : i32, i32
  }
  func.func @transform_9(%arg0: i32) -> (i32, i32) {
    %c0_i32 = arith.constant 0 : i32
    %c0_i32_0 = arith.constant 0 : i32
    %c0_i32_1 = arith.constant 0 : i32
    return %c0_i32, %c0_i32_0 : i32, i32
  }
  func.func @transform_10(%arg0: i32) -> (i32, i32) {
    %c0_i32 = arith.constant 0 : i32
    %c0_i32_0 = arith.constant 0 : i32
    %c0_i32_1 = arith.constant 0 : i32
    return %c0_i32, %c0_i32_0 : i32, i32
  }
  func.func @transform_11(%arg0: i32) -> (i32, i32) {
    %c0_i32 = arith.constant 0 : i32
    %c0_i32_0 = arith.constant 0 : i32
    return %arg0, %c0_i32 : i32, i32
  }
}

</mosaic_0001>

<bundles_post_ra>
// kernel: tpu_custom_call.1
= control target key start
LH: loop header
LB: loop body
LE: loop exit
PB: predicated region body
PF: predicated region fallthrough
CT: control target
= control target key end

     0   :  { %16 = vsyncpa [#allocation3], 0  ;;  %s1131_s0 = inlined_call_operand.hbm [shape: f32[2,32], index: 0, kind: input, shape index: {}]   ;;  %s1132_s1 = inlined_call_operand.hbm [shape: f32[32,128], index: 1, kind: input, shape index: {}]   ;;  %s1133_s2 = inlined_call_operand.vmem [shape: f32[1,128], index: 2, kind: input, shape index: {}]   ;;  %s1134_s3 = inlined_call_operand.hbm [shape: f32[128,128], index: 3, kind: input, shape index: {}]   ;;  %s1135_s4 = inlined_call_operand.vmem [shape: f32[1,128], index: 4, kind: input, shape index: {}]   ;;  %s1136_s5 = inlined_call_operand.hbm [shape: f32[128,128], index: 5, kind: input, shape index: {}]   ;;  %s1137_s6 = inlined_call_operand.vmem [shape: f32[1,128], index: 6, kind: input, shape index: {}]   ;;  %s1138_s7 = inlined_call_operand.hbm [shape: f32[128,256], index: 7, kind: input, shape index: {}]   ;;  %s1139_s8 = inlined_call_operand.vmem [shape: f32[1,256], index: 8, kind: input, shape index: {}]   ;;  %s1140_s9 = inlined_call_operand.hbm [shape: f32[256,256], index: 9, kind: input, shape index: {}]   ;;  %s1141_s10 = inlined_call_operand.vmem [shape: f32[1,256], index: 10, kind: input, shape index: {}]   ;;  %s1142_s11 = inlined_call_operand.hbm [shape: f32[2,128], index: 11, kind: output, shape index: {}]  }
   0x1   :  { %17 = vsyncpa [#allocation6], 0 }
   0x2   :  { %18 = vsyncpa [#allocation9], 0 }
   0x3   :  { %19 = vsyncpa [#allocation12], 0 }
   0x4   :  { %20 = vsyncpa [#allocation4], 0  ;;  %s970_s17 = smov [#allocation5]  }
   0x5   :  { %s36_s18 = sshll.u32 %s970_s17, 4  ;;  %s37_s18 = int_to_ptr.vmem [resolvable:$true] %s36_s18 }
   0x6   :  { %s828_s19 = scalar_lea.vmem %s37_s18, 512  ;;  %p833_p1 = scmp.lt.s32.totalorder %s37_s18, %s37_s18 }
   0x7   :  { %p829_p0 = scmp.ne.s32.totalorder %s37_s18, %s828_s19  ;;  %p834_p2 = scmp.lt.s32.totalorder %s828_s19, %s828_s19 }
   0x9   :  { %p835_p3 = por %p834_p2, %p833_p1 }
   0xb   :  { %p836_p4 = pnand %p835_p3, %p829_p0 }
   0xd   :  { %839 = shalt.err (!%p836_p4)
}
   0xe   :  { %s971_s20 = smov 128   ;;  %s972_s21 = smov 8  }
   0xf   :  { %42 = dma.hbm_to_vmem [thread:$0]  %s1132_s1, 512, %s37_s18, [#allocation6], %s971_s20, %s971_s20, %s972_s21  }
  0x10   :  { %s973_s24 = smov [#allocation8]   ;;  %s974_s26 = smov [#allocation2]  }
  0x11   :  { %s64_s25 = sshll.u32 %s973_s24, 4  ;;  %s27_s27 = sshll.u32 %s974_s26, 4  ;;  %s65_s25 = int_to_ptr.vmem [resolvable:$true] %s64_s25  ;;  %s28_s27 = int_to_ptr.vmem [resolvable:$true] %s27_s27 }
  0x12   :  { %s848_s28 = scalar_lea.vmem %s65_s25, 2048  ;;  %p853_p6 = scmp.lt.s32.totalorder %s65_s25, %s65_s25 }
  0x13   :  { %p849_p5 = scmp.ne.s32.totalorder %s65_s25, %s848_s28  ;;  %p854_p7 = scmp.lt.s32.totalorder %s848_s28, %s848_s28 }
  0x15   :  { %p855_p8 = por %p854_p7, %p853_p6 }
  0x17   :  { %p856_p9 = pnand %p855_p8, %p849_p5 }
  0x19   :  { %859 = shalt.err (!%p856_p9)
}
  0x1a   :  { %70 = dma.hbm_to_vmem [thread:$0]  %s1136_s5, 2048, %s65_s25, [#allocation9], %s971_s20, %s971_s20, %s972_s21  }
  0x1b   :  { %s868_s1 = scalar_lea.vmem %s28_s27, 32  ;;  %p873_p11 = scmp.lt.s32.totalorder %s28_s27, %s28_s27 }
  0x1c   :  { %p869_p10 = scmp.ne.s32.totalorder %s28_s27, %s868_s1  ;;  %p874_p12 = scmp.lt.s32.totalorder %s868_s1, %s868_s1 }
  0x1e   :  { %p875_p13 = por %p874_p12, %p873_p11 }
  0x20   :  { %p876_p0 = pnand %p875_p13, %p869_p10 }
  0x22   :  { %879 = shalt.err (!%p876_p0)
}
  0x23   :  { %30 = dma.hbm_to_vmem [thread:$0]  %s1131_s0, 32, %s28_s27, [#allocation3]  }
  0x24   :  { %s975_s14 = smov [#allocation7]   ;;  %s976_s16 = smov [#allocation10]  }
  0x25   :  { %s50_s15 = sshll.u32 %s975_s14, 4  ;;  %s78_s17 = sshll.u32 %s976_s16, 4  ;;  %s51_s15 = int_to_ptr.vmem [resolvable:$true] %s50_s15  ;;  %s79_s17 = int_to_ptr.vmem [resolvable:$true] %s78_s17 }
  0x26   :  { %s888_s18 = scalar_lea.vmem %s51_s15, 2048  ;;  %p893_p2 = scmp.lt.s32.totalorder %s51_s15, %s51_s15 }
  0x27   :  { %p889_p1 = scmp.ne.s32.totalorder %s51_s15, %s888_s18  ;;  %p894_p3 = scmp.lt.s32.totalorder %s888_s18, %s888_s18 }
  0x29   :  { %p895_p4 = por %p894_p3, %p893_p2 }
  0x2b   :  { %p896_p5 = pnand %p895_p4, %p889_p1 }
  0x2d   :  { %899 = shalt.err (!%p896_p5)
}
  0x2e   :  { %56 = dma.hbm_to_vmem [thread:$0]  %s1134_s3, 2048, %s51_s15, [#allocation6], %s971_s20, %s971_s20, %s972_s21  }
  0x2f   :  { %s908_s0 = scalar_lea.vmem %s79_s17, 4096  ;;  %p913_p7 = scmp.lt.s32.totalorder %s79_s17, %s79_s17 }
  0x30   :  { %p909_p6 = scmp.ne.s32.totalorder %s79_s17, %s908_s0  ;;  %p914_p8 = scmp.lt.s32.totalorder %s908_s0, %s908_s0 }
  0x32   :  { %p915_p9 = por %p914_p8, %p913_p7 }
  0x34   :  { %p916_p10 = pnand %p915_p9, %p909_p6 }
  0x36   :  { %919 = shalt.err (!%p916_p10)
}
  0x37   :  { %s977_s22 = smov 256   ;;  %s978_s23 = smov 16  }
  0x38   :  { %84 = dma.hbm_to_vmem [thread:$0]  %s1138_s7, 4096, %s79_s17, [#allocation9], %s977_s22, %s977_s22, %s978_s23  }
  0x39   :  { %s979_s26 = smov [#allocation11]  }
  0x3a   :  { %s92_s27 = sshll.u32 %s979_s26, 4  ;;  %s93_s27 = int_to_ptr.vmem [resolvable:$true] %s92_s27 }
  0x3b   :  { %s928_s28 = scalar_lea.vmem %s93_s27, 8192  ;;  %p933_p12 = scmp.lt.s32.totalorder %s93_s27, %s93_s27 }
  0x3c   :  { %p929_p11 = scmp.ne.s32.totalorder %s93_s27, %s928_s28  ;;  %p934_p13 = scmp.lt.s32.totalorder %s928_s28, %s928_s28 }
  0x3e   :  { %p935_p0 = por %p934_p13, %p933_p12 }
  0x40   :  { %p936_p1 = pnand %p935_p0, %p929_p11 }
  0x42   :  { %939 = shalt.err (!%p936_p1)
}
  0x43   :  { %98 = dma.hbm_to_vmem [thread:$0]  %s1140_s9, 8192, %s93_s27, [#allocation12], %s977_s22, %s977_s22, %s978_s23  }
  0x44   :  { %960 = dma.done.wait [#allocation3], 32  }
  0x45   :  { %961 = vsyncadd [#allocation3], 4294967264 }
  0x46   :  { %962 = dma.done.wait [#allocation6], 2560  }
  0x47   :  { %963 = vsyncadd [#allocation6], 4294964736 }
  0x48   :  { %964 = dma.done.wait [#allocation9], 6144  }
  0x49   :  { %965 = vsyncadd [#allocation9], 4294961152 }
  0x4a   :  { %966 = dma.done.wait [#allocation12], 8192  }
  0x4b   :  { %967 = vsyncadd [#allocation12], 4294959104  ;;  %v980_v0 = vmov 0.0   ;;  %vm981_vm0 = vmmov 0   ;;  %v123_v1 = vld [vmem:[#allocation5 + $0x18] sm:$0xff]  ;;  %v122_v2 = vld [vmem:[#allocation5 + $0x10] sm:$0xff] }
  0x4c   :  { %726 = vmatprep.subr.mxu1 %v980_v0  ;;  %734 = vmatprep.mubr.msk.f32.mxu1 %vm981_vm0, %v980_v0  ;;  %v121_v3 = vld [vmem:[#allocation5 + $0x8] sm:$0xff]  ;;  %v120_v4 = vld [vmem:[#allocation5] sm:$0xff]  ;;  %v119_v5 = vld [vmem:[#allocation2] sm:$0x3]  ;;  %vm131_vm1 = vcmask 261120   ;;  %vm657_vm2 = vcmask 1041408  }
  0x4d   :  { %772 = vmatprep.subr.mxu0 %v980_v0  ;;  %804 = vmatprep.mubr.msk.f32.mxu0 %vm981_vm0, %v980_v0  ;;  %v221_v6 = vld [vmem:[#allocation7 + $0x78] sm:$0xff]  ;;  %v220_v7 = vld [vmem:[#allocation7 + $0x70] sm:$0xff]  ;;  %v219_v8 = vld [vmem:[#allocation7 + $0x68] sm:$0xff] }
  0x4e   :  { %727 = vmatpush3.msra.mxu1 %v123_v1  ;;  %v218_v9 = vld [vmem:[#allocation7 + $0x60] sm:$0xff]  ;;  %v217_v10 = vld [vmem:[#allocation7 + $0x58] sm:$0xff]  ;;  %v216_v11 = vld [vmem:[#allocation7 + $0x50] sm:$0xff] }
  0x4f   :  { %728 = vmatprep.subr.mxu1 %v980_v0  ;;  %v215_v12 = vld [vmem:[#allocation7 + $0x48] sm:$0xff]  ;;  %v214_v13 = vld [vmem:[#allocation7 + $0x40] sm:$0xff]  ;;  %v213_v14 = vld [vmem:[#allocation7 + $0x38] sm:$0xff] }
  0x50   :  { %729 = vmatpush3.msra.mxu1 %v122_v2  ;;  %v212_v15 = vld [vmem:[#allocation7 + $0x30] sm:$0xff]  ;;  %v211_v16 = vld [vmem:[#allocation7 + $0x28] sm:$0xff]  ;;  %v210_v17 = vld [vmem:[#allocation7 + $0x20] sm:$0xff] }
  0x51   :  { %730 = vmatprep.subr.mxu1 %v980_v0  ;;  %v209_v18 = vld [vmem:[#allocation7 + $0x18] sm:$0xff]  ;;  %v208_v19 = vld [vmem:[#allocation7 + $0x10] sm:$0xff]  ;;  %v207_v20 = vld [vmem:[#allocation7 + $0x8] sm:$0xff] }
  0x52   :  { %731 = vmatpush3.msra.mxu1 %v121_v3  ;;  %v206_v21 = vld [vmem:[#allocation7] sm:$0xff]  ;;  %v315_v22 = vld [vmem:[#allocation8 + $0x78] sm:$0xff]  ;;  %v314_v23 = vld [vmem:[#allocation8 + $0x70] sm:$0xff] }
  0x53   :  { %732 = vmatprep.subr.mxu1 %v980_v0  ;;  %773 = vmatpush3.msra.mxu0 %v315_v22  ;;  %v313_v24 = vld [vmem:[#allocation8 + $0x68] sm:$0xff]  ;;  %v312_v25 = vld [vmem:[#allocation8 + $0x60] sm:$0xff]  ;;  %v311_v26 = vld [vmem:[#allocation8 + $0x58] sm:$0xff] }
  0x54   :  { %733 = vmatpush3.msra.mxu1 %v120_v4  ;;  %774 = vmatprep.subr.mxu0 %v980_v0  ;;  %v310_v27 = vld [vmem:[#allocation8 + $0x50] sm:$0xff]  ;;  %v309_v28 = vld [vmem:[#allocation8 + $0x48] sm:$0xff]  ;;  %v308_v29 = vld [vmem:[#allocation8 + $0x40] sm:$0xff] }
  0x55   :  { %735 = vmatmul.mubr.msk.f32.vlgmr.msra.gmra.mxu1 %vm131_vm1, %v119_v5  ;;  %737 = vmatprep.subr.mxu1 %v980_v0  ;;  %v307_v30 = vld [vmem:[#allocation8 + $0x38] sm:$0xff]  ;;  %v306_v31 = vld [vmem:[#allocation8 + $0x30] sm:$0xff]  ;;  %v305_v32 = vld [vmem:[#allocation8 + $0x28] sm:$0xff] }
  0x56   :  { %738 = vmatpush3.msra.mxu1 %v221_v6  ;;  %769 = vmatprep.mubr.msk.f32.mxu1 %vm981_vm0, %v980_v0  ;;  %v304_v33 = vld [vmem:[#allocation8 + $0x20] sm:$0xff]  ;;  %v303_v34 = vld [vmem:[#allocation8 + $0x18] sm:$0xff]  ;;  %v302_v40 = vld [vmem:[#allocation8 + $0x10] sm:$0xff] }
  0x57   :  { %739 = vmatprep.subr.mxu1 %v980_v0  ;;  %775 = vmatpush3.msra.mxu0 %v314_v23  ;;  %v683_v35 = vld [vmem:[%s1133_s2] ss:$0 sm:$0xff]  ;;  %v301_v41 = vld [vmem:[#allocation8 + $0x8] sm:$0xff]  ;;  %v300_v42 = vld [vmem:[#allocation8] sm:$0xff] }
  0x58   :  { %740 = vmatpush3.msra.mxu1 %v220_v7  ;;  %776 = vmatprep.subr.mxu0 %v980_v0  ;;  %v424_v43 = vld [vmem:[#allocation10 + $0xf8] sm:$0xff]  ;;  %v423_v44 = vld [vmem:[#allocation10 + $0xf0] sm:$0xff]  ;;  %v422_v45 = vld [vmem:[#allocation10 + $0xe8] sm:$0xff] }
  0x59   :  { %741 = vmatprep.subr.mxu1 %v980_v0  ;;  %777 = vmatpush3.msra.mxu0 %v313_v24  ;;  %v421_v46 = vld [vmem:[#allocation10 + $0xe0] sm:$0xff]  ;;  %v420_v47 = vld [vmem:[#allocation10 + $0xd8] sm:$0xff]  ;;  %v419_v48 = vld [vmem:[#allocation10 + $0xd0] sm:$0xff] }
  0x5a   :  { %742 = vmatpush3.msra.mxu1 %v219_v8  ;;  %778 = vmatprep.subr.mxu0 %v980_v0  ;;  %v418_v49 = vld [vmem:[#allocation10 + $0xc8] sm:$0xff]  ;;  %v417_v50 = vld [vmem:[#allocation10 + $0xc0] sm:$0xff]  ;;  %v416_v51 = vld [vmem:[#allocation10 + $0xb8] sm:$0xff] }
  0x5b   :  { %743 = vmatprep.subr.mxu1 %v980_v0  ;;  %779 = vmatpush3.msra.mxu0 %v312_v25  ;;  %v415_v52 = vld [vmem:[#allocation10 + $0xb0] sm:$0xff]  ;;  %v414_v53 = vld [vmem:[#allocation10 + $0xa8] sm:$0xff]  ;;  %v413_v54 = vld [vmem:[#allocation10 + $0xa0] sm:$0xff] }
  0x5c   :  { %744 = vmatpush3.msra.mxu1 %v218_v9  ;;  %780 = vmatprep.subr.mxu0 %v980_v0  ;;  %v412_v55 = vld [vmem:[#allocation10 + $0x98] sm:$0xff]  ;;  %v411_v56 = vld [vmem:[#allocation10 + $0x90] sm:$0xff]  ;;  %v410_v57 = vld [vmem:[#allocation10 + $0x88] sm:$0xff] }
  0x5d   :  { %745 = vmatprep.subr.mxu1 %v980_v0  ;;  %781 = vmatpush3.msra.mxu0 %v311_v26  ;;  %v409_v58 = vld [vmem:[#allocation10 + $0x80] sm:$0xff]  ;;  %v408_v59 = vld [vmem:[#allocation10 + $0x78] sm:$0xff]  ;;  %v407_v60 = vld [vmem:[#allocation10 + $0x70] sm:$0xff] }
  0x5e   :  { %746 = vmatpush3.msra.mxu1 %v217_v10  ;;  %782 = vmatprep.subr.mxu0 %v980_v0  ;;  %v406_v61 = vld [vmem:[#allocation10 + $0x68] sm:$0xff]  ;;  %v405_v62 = vld [vmem:[#allocation10 + $0x60] sm:$0xff]  ;;  %v404_v63 = vld [vmem:[#allocation10 + $0x58] sm:$0xff] }
  0x5f   :  { %747 = vmatprep.subr.mxu1 %v980_v0  ;;  %783 = vmatpush3.msra.mxu0 %v310_v27  ;;  %v402_v1 = vld [vmem:[#allocation10 + $0x48] sm:$0xff]  ;;  %v401_v2 = vld [vmem:[#allocation10 + $0x40] sm:$0xff]  ;;  %v400_v3 = vld [vmem:[#allocation10 + $0x38] sm:$0xff] }
  0x60   :  { %748 = vmatpush3.msra.mxu1 %v216_v11  ;;  %784 = vmatprep.subr.mxu0 %v980_v0  ;;  %v399_v4 = vld [vmem:[#allocation10 + $0x30] sm:$0xff]  ;;  %v398_v5 = vld [vmem:[#allocation10 + $0x28] sm:$0xff]  ;;  %v397_v6 = vld [vmem:[#allocation10 + $0x20] sm:$0xff] }
  0x61   :  { %749 = vmatprep.subr.mxu1 %v980_v0  ;;  %785 = vmatpush3.msra.mxu0 %v309_v28  ;;  %v396_v7 = vld [vmem:[#allocation10 + $0x18] sm:$0xff]  ;;  %v535_v22 = vld [vmem:[#allocation11 + $0xc8] sm:$0xff]  ;;  %v534_v23 = vld [vmem:[#allocation11 + $0xc0] sm:$0xff] }
  0x62   :  { %750 = vmatpush3.msra.mxu1 %v215_v12  ;;  %786 = vmatprep.subr.mxu0 %v980_v0  ;;  %v685_v8 = vld [vmem:[%s1135_s4] ss:$0 sm:$0xff]  ;;  %v532_v25 = vld [vmem:[#allocation11 + $0xb0] sm:$0xff]  ;;  %v531_v26 = vld [vmem:[#allocation11 + $0xa8] sm:$0xff] }
  0x63   :  { %751 = vmatprep.subr.mxu1 %v980_v0  ;;  %787 = vmatpush3.msra.mxu0 %v308_v29  ;;  %v533_v24 = vld [vmem:[#allocation11 + $0xb8] sm:$0xff]  ;;  %v530_v27 = vld [vmem:[#allocation11 + $0xa0] sm:$0xff]  ;;  %v528_v29 = vld [vmem:[#allocation11 + $0x90] sm:$0xff] }
  0x64   :  { %752 = vmatpush3.msra.mxu1 %v214_v13  ;;  %788 = vmatprep.subr.mxu0 %v980_v0  ;;  %v395_v13 = vld [vmem:[#allocation10 + $0x10] sm:$0xff]  ;;  %v529_v28 = vld [vmem:[#allocation11 + $0x98] sm:$0xff] }
  0x65   :  { %753 = vmatprep.subr.mxu1 %v980_v0  ;;  %789 = vmatpush3.msra.mxu0 %v307_v30  ;;  %v527_v30 = vld [vmem:[#allocation11 + $0x88] sm:$0xff] }
  0x66   :  { %754 = vmatpush3.msra.mxu1 %v213_v14  ;;  %790 = vmatprep.subr.mxu0 %v980_v0  ;;  %v394_v14 = vld [vmem:[#allocation10 + $0x8] sm:$0xff] }
  0x67   :  { %755 = vmatprep.subr.mxu1 %v980_v0  ;;  %791 = vmatpush3.msra.mxu0 %v306_v31  ;;  %v526_v31 = vld [vmem:[#allocation11 + $0x80] sm:$0xff] }
  0x68   :  { %756 = vmatpush3.msra.mxu1 %v212_v15  ;;  %792 = vmatprep.subr.mxu0 %v980_v0  ;;  %v393_v15 = vld [vmem:[#allocation10] sm:$0xff] }
  0x69   :  { %757 = vmatprep.subr.mxu1 %v980_v0  ;;  %793 = vmatpush3.msra.mxu0 %v305_v32  ;;  %v525_v32 = vld [vmem:[#allocation11 + $0x78] sm:$0xff] }
  0x6a   :  { %758 = vmatpush3.msra.mxu1 %v211_v16  ;;  %794 = vmatprep.subr.mxu0 %v980_v0  ;;  %v541_v16 = vld [vmem:[#allocation11 + $0xf8] sm:$0xff] }
  0x6b   :  { %759 = vmatprep.subr.mxu1 %v980_v0  ;;  %795 = vmatpush3.msra.mxu0 %v304_v33  ;;  %v524_v33 = vld [vmem:[#allocation11 + $0x70] sm:$0xff] }
  0x6c   :  { %760 = vmatpush3.msra.mxu1 %v210_v17  ;;  %796 = vmatprep.subr.mxu0 %v980_v0  ;;  %v540_v17 = vld [vmem:[#allocation11 + $0xf0] sm:$0xff] }
  0x6d   :  { %761 = vmatprep.subr.mxu1 %v980_v0  ;;  %797 = vmatpush3.msra.mxu0 %v303_v34  ;;  %v523_v34 = vld [vmem:[#allocation11 + $0x68] sm:$0xff] }
  0x6e   :  { %762 = vmatpush3.msra.mxu1 %v209_v18  ;;  %798 = vmatprep.subr.mxu0 %v980_v0  ;;  %v539_v18 = vld [vmem:[#allocation11 + $0xe8] sm:$0xff] }
  0x6f   :  { %763 = vmatprep.subr.mxu1 %v980_v0  ;;  %799 = vmatpush3.msra.mxu0 %v302_v40  ;;  %v517_v40 = vld [vmem:[#allocation11 + $0x38] sm:$0xff] }
  0x70   :  { %764 = vmatpush3.msra.mxu1 %v208_v19  ;;  %800 = vmatprep.subr.mxu0 %v980_v0  ;;  %v538_v19 = vld [vmem:[#allocation11 + $0xe0] sm:$0xff] }
  0x71   :  { %765 = vmatprep.subr.mxu1 %v980_v0  ;;  %801 = vmatpush3.msra.mxu0 %v301_v41  ;;  %v516_v41 = vld [vmem:[#allocation11 + $0x30] sm:$0xff] }
  0x72   :  { %766 = vmatpush3.msra.mxu1 %v207_v20  ;;  %802 = vmatprep.subr.mxu0 %v980_v0  ;;  %v537_v20 = vld [vmem:[#allocation11 + $0xd8] sm:$0xff] }
  0x73   :  { %767 = vmatprep.subr.mxu1 %v980_v0  ;;  %803 = vmatpush3.msra.mxu0 %v300_v42  ;;  %v515_v42 = vld [vmem:[#allocation11 + $0x28] sm:$0xff] }
  0x74   :  { %768 = vmatpush3.msra.mxu1 %v206_v21  ;;  %586 = vmatprep.subr.mxu0 %v541_v16  ;;  %v536_v21 = vld [vmem:[#allocation11 + $0xd0] sm:$0xff]  ;;  %v545_v16 = vld [vmem:[#allocation11 + $0x118] sm:$0xff] }
  0x75   :  { %437 = vmatprep.subr.mxu1 %v424_v43  ;;  %v514_v43 = vld [vmem:[#allocation11 + $0x20] sm:$0xff] }
 0x115   :  { %v201_v36 = vpop.f32.mrf.mxu1 }
 0x116   :  { %v202_v37 = vadd.f32 %v683_v35, %v201_v36  ;;  %v522_v35 = vld [vmem:[#allocation11 + $0x60] sm:$0xff]  ;;  %v521_v36 = vld [vmem:[#allocation11 + $0x58] sm:$0xff] }
 0x117   :  { %v736_v38 = vpop.f32.mrf.mxu1 }
 0x118   :  { %v205_v39 = vmax.f32 %v202_v37, 0.0  ;;  %v520_v37 = vld [vmem:[#allocation11 + $0x50] sm:$0xff]  ;;  %v519_v38 = vld [vmem:[#allocation11 + $0x48] sm:$0xff] }
 0x11a   :  { %770 = vmatmul.mubr.f32.vlgmr.msra.gmra.mxu1 %v205_v39  ;;  %v518_v39 = vld [vmem:[#allocation11 + $0x40] sm:$0xff] }
 0x11b   :  { %501 = vmatprep.mubr.f32.mxu1 %v980_v0  ;;  %438 = vmatpush1.msra.mxu1 %v423_v44  ;;  %v403_v0 = vld [vmem:[#allocation10 + $0x50] sm:$0xff]  ;;  %v513_v44 = vld [vmem:[#allocation11 + $0x18] sm:$0xff] }
 0x11c   :  { %439 = vmatprep.subr.mxu1 %v422_v45  ;;  %v512_v45 = vld [vmem:[#allocation11 + $0x10] sm:$0xff] }
 0x11d   :  { %440 = vmatpush1.msra.mxu1 %v421_v46  ;;  %v511_v46 = vld [vmem:[#allocation11 + $0x8] sm:$0xff] }
 0x11e   :  { %441 = vmatprep.subr.mxu1 %v420_v47  ;;  %v510_v47 = vld [vmem:[#allocation11] sm:$0xff] }
 0x11f   :  { %442 = vmatpush1.msra.mxu1 %v419_v48  ;;  %v573_v48 = vld [vmem:[#allocation11 + $0x1f8] sm:$0xff] }
 0x120   :  { %443 = vmatprep.subr.mxu1 %v418_v49  ;;  %v572_v49 = vld [vmem:[#allocation11 + $0x1f0] sm:$0xff] }
 0x121   :  { %444 = vmatpush1.msra.mxu1 %v417_v50  ;;  %v571_v50 = vld [vmem:[#allocation11 + $0x1e8] sm:$0xff] }
 0x122   :  { %445 = vmatprep.subr.mxu1 %v416_v51  ;;  %v570_v51 = vld [vmem:[#allocation11 + $0x1e0] sm:$0xff] }
 0x123   :  { %446 = vmatpush1.msra.mxu1 %v415_v52  ;;  %v569_v52 = vld [vmem:[#allocation11 + $0x1d8] sm:$0xff] }
 0x124   :  { %447 = vmatprep.subr.mxu1 %v414_v53  ;;  %v568_v53 = vld [vmem:[#allocation11 + $0x1d0] sm:$0xff] }
 0x125   :  { %448 = vmatpush1.msra.mxu1 %v413_v54  ;;  %v567_v54 = vld [vmem:[#allocation11 + $0x1c8] sm:$0xff] }
 0x126   :  { %449 = vmatprep.subr.mxu1 %v412_v55  ;;  %v566_v55 = vld [vmem:[#allocation11 + $0x1c0] sm:$0xff] }
 0x127   :  { %450 = vmatpush1.msra.mxu1 %v411_v56  ;;  %v565_v56 = vld [vmem:[#allocation11 + $0x1b8] sm:$0xff] }
 0x128   :  { %451 = vmatprep.subr.mxu1 %v410_v57  ;;  %v564_v57 = vld [vmem:[#allocation11 + $0x1b0] sm:$0xff] }
 0x129   :  { %452 = vmatpush1.msra.mxu1 %v409_v58  ;;  %v563_v58 = vld [vmem:[#allocation11 + $0x1a8] sm:$0xff] }
 0x12a   :  { %453 = vmatprep.subr.mxu1 %v408_v59  ;;  %v562_v59 = vld [vmem:[#allocation11 + $0x1a0] sm:$0xff] }
 0x12b   :  { %454 = vmatpush1.msra.mxu1 %v407_v60  ;;  %v561_v60 = vld [vmem:[#allocation11 + $0x198] sm:$0xff] }
 0x12c   :  { %455 = vmatprep.subr.mxu1 %v406_v61  ;;  %v560_v61 = vld [vmem:[#allocation11 + $0x190] sm:$0xff] }
 0x12d   :  { %456 = vmatpush1.msra.mxu1 %v405_v62  ;;  %v559_v62 = vld [vmem:[#allocation11 + $0x188] sm:$0xff] }
 0x12e   :  { %457 = vmatprep.subr.mxu1 %v404_v63  ;;  %v558_v63 = vld [vmem:[#allocation11 + $0x180] sm:$0xff] }
 0x12f   :  { %458 = vmatpush1.msra.mxu1 %v403_v0  ;;  %v557_v0 = vld [vmem:[#allocation11 + $0x178] sm:$0xff] }
 0x130   :  { %459 = vmatprep.subr.mxu1 %v402_v1  ;;  %v556_v1 = vld [vmem:[#allocation11 + $0x170] sm:$0xff] }
 0x131   :  { %460 = vmatpush1.msra.mxu1 %v401_v2  ;;  %v555_v2 = vld [vmem:[#allocation11 + $0x168] sm:$0xff] }
 0x132   :  { %461 = vmatprep.subr.mxu1 %v400_v3  ;;  %v554_v3 = vld [vmem:[#allocation11 + $0x160] sm:$0xff] }
 0x133   :  { %462 = vmatpush1.msra.mxu1 %v399_v4  ;;  %v553_v4 = vld [vmem:[#allocation11 + $0x158] sm:$0xff] }
 0x134   :  { %463 = vmatprep.subr.mxu1 %v398_v5  ;;  %v552_v5 = vld [vmem:[#allocation11 + $0x150] sm:$0xff] }
 0x135   :  { %464 = vmatpush1.msra.mxu1 %v397_v6  ;;  %v551_v6 = vld [vmem:[#allocation11 + $0x148] sm:$0xff] }
 0x136   :  { %465 = vmatprep.subr.mxu1 %v396_v7  ;;  %v550_v7 = vld [vmem:[#allocation11 + $0x140] sm:$0xff] }
 0x137   :  { %466 = vmatpush1.msra.mxu1 %v395_v13  ;;  %v548_v13 = vld [vmem:[#allocation11 + $0x130] sm:$0xff] }
 0x138   :  { %467 = vmatprep.subr.mxu1 %v394_v14  ;;  %v547_v14 = vld [vmem:[#allocation11 + $0x128] sm:$0xff] }
 0x139   :  { %468 = vmatpush1.msra.mxu1 %v393_v15  ;;  %v546_v15 = vld [vmem:[#allocation11 + $0x120] sm:$0xff] }
 0x1da   :  { %v295_v9 = vpop.f32.mrf.mxu1 }
 0x1db   :  { %v296_v10 = vadd.f32 %v685_v8, %v295_v9  ;;  %v686_v8 = vld [vmem:[%s1137_s6] ss:$0 sm:$0xff] }
 0x1dc   :  { %v771_v11 = vpop.f32.mrf.mxu1 }
 0x1dd   :  { %v299_v12 = vmax.f32 %v296_v10, 0.0 }
 0x1df   :  { %805 = vmatmul.mubr.f32.vlgmr.msra.gmra.mxu0 %v299_v12  ;;  %v549_v12 = vld [vmem:[#allocation11 + $0x138] sm:$0xff] }
 0x1e0   :  { %587 = vmatpush1.msra.mxu0 %v540_v17  ;;  %v544_v17 = vld [vmem:[#allocation11 + $0x110] sm:$0xff] }
 0x1e1   :  { %588 = vmatprep.subr.mxu0 %v539_v18  ;;  %v543_v18 = vld [vmem:[#allocation11 + $0x108] sm:$0xff] }
 0x1e2   :  { %589 = vmatpush1.msra.mxu0 %v538_v19  ;;  %v542_v19 = vld [vmem:[#allocation11 + $0x100] sm:$0xff] }
 0x1e3   :  { %590 = vmatprep.subr.mxu0 %v537_v20  ;;  %v427_v20 = vlaneseq }
 0x1e4   :  { %591 = vmatpush1.msra.mxu0 %v536_v21 }
 0x1e5   :  { %592 = vmatprep.subr.mxu0 %v535_v22  ;;  %v428_v21 = vshrl.u32 %v427_v20, 7 }
 0x1e6   :  { %593 = vmatpush1.msra.mxu0 %v534_v23  ;;  %v425_v23 = vld [vmem:[%s1139_s8] sm:$0x3]  ;;  %s982_s8 = smov [#allocation13]  }
 0x1e7   :  { %594 = vmatprep.subr.mxu0 %v533_v24  ;;  %v429_v22 = vsub.s32 0, %v428_v21  ;;  %v433_v24 = vsub.s32 1, %v428_v21  ;;  %s671_s13 = sshll.u32 %s982_s8, 4  ;;  %s672_s13 = int_to_ptr.vmem [resolvable:$true] %s671_s13 }
 0x1e8   :  { %595 = vmatpush1.msra.mxu0 %v532_v25  ;;  %s940_s14 = scalar_lea.vmem %s672_s13, 32  ;;  %p945_p3 = scmp.lt.s32.totalorder %s672_s13, %s672_s13 }
 0x1e9   :  { %596 = vmatprep.subr.mxu0 %v531_v26  ;;  %v430_v25 = vrot.slane %v425_v23, %v429_v22  ;;  %v434_v26 = vrot.slane %v425_v23, %v433_v24  ;;  %p941_p2 = scmp.ne.s32.totalorder %s672_s13, %s940_s14  ;;  %p946_p4 = scmp.lt.s32.totalorder %s940_s14, %s940_s14 }
 0x1ea   :  { %597 = vmatpush1.msra.mxu0 %v530_v27 }
 0x1eb   :  { %598 = vmatprep.subr.mxu0 %v529_v28  ;;  %p947_p5 = por %p946_p4, %p945_p3 }
 0x1ec   :  { %599 = vmatpush1.msra.mxu0 %v528_v29 }
 0x1ed   :  { %600 = vmatprep.subr.mxu0 %v527_v30  ;;  %p948_p6 = pnand %p947_p5, %p941_p2 }
 0x1ee   :  { %601 = vmatpush1.msra.mxu0 %v526_v31 }
 0x1ef   :  { %602 = vmatprep.subr.mxu0 %v525_v32 }
 0x1f0   :  { %603 = vmatpush1.msra.mxu0 %v524_v33  ;;  %v574_v33 = vld [vmem:[%s1141_s10] sm:$0x3] }
 0x1f1   :  { %604 = vmatprep.subr.mxu0 %v523_v34  ;;  %v579_v34 = vrot.slane %v574_v33, %v429_v22 }
 0x1f2   :  { %605 = vmatpush1.msra.mxu0 %v522_v35 }
 0x1f3   :  { %606 = vmatprep.subr.mxu0 %v521_v36 }
 0x1f4   :  { %607 = vmatpush1.msra.mxu0 %v520_v37 }
 0x1f5   :  { %608 = vmatprep.subr.mxu0 %v519_v38  ;;  %v583_v38 = vrot.slane %v574_v33, %v433_v24 }
 0x1f6   :  { %609 = vmatpush1.msra.mxu0 %v518_v39 }
 0x1f7   :  { %610 = vmatprep.subr.mxu0 %v517_v40 }
 0x1f8   :  { %611 = vmatpush1.msra.mxu0 %v516_v41 }
 0x1f9   :  { %612 = vmatprep.subr.mxu0 %v515_v42 }
 0x1fa   :  { %613 = vmatpush1.msra.mxu0 %v514_v43 }
 0x1fb   :  { %614 = vmatprep.subr.mxu0 %v513_v44 }
 0x1fc   :  { %615 = vmatpush1.msra.mxu0 %v512_v45 }
 0x1fd   :  { %616 = vmatprep.subr.mxu0 %v511_v46 }
 0x1fe   :  { %617 = vmatpush1.msra.mxu0 %v510_v47 }
 0x1ff   :  { %618 = vmatprep.subr.mxu0 %v573_v48 }
 0x200   :  { %619 = vmatpush2.msra.mxu0 %v572_v49 }
 0x201   :  { %620 = vmatprep.subr.mxu0 %v571_v50 }
 0x202   :  { %621 = vmatpush2.msra.mxu0 %v570_v51 }
 0x203   :  { %622 = vmatprep.subr.mxu0 %v569_v52 }
 0x204   :  { %623 = vmatpush2.msra.mxu0 %v568_v53 }
 0x205   :  { %624 = vmatprep.subr.mxu0 %v567_v54 }
 0x206   :  { %625 = vmatpush2.msra.mxu0 %v566_v55 }
 0x207   :  { %626 = vmatprep.subr.mxu0 %v565_v56 }
 0x208   :  { %627 = vmatpush2.msra.mxu0 %v564_v57 }
 0x209   :  { %628 = vmatprep.subr.mxu0 %v563_v58 }
 0x20a   :  { %629 = vmatpush2.msra.mxu0 %v562_v59 }
 0x20b   :  { %630 = vmatprep.subr.mxu0 %v561_v60 }
 0x20c   :  { %631 = vmatpush2.msra.mxu0 %v560_v61 }
 0x20d   :  { %632 = vmatprep.subr.mxu0 %v559_v62 }
 0x20e   :  { %633 = vmatpush2.msra.mxu0 %v558_v63 }
 0x20f   :  { %634 = vmatprep.subr.mxu0 %v557_v0 }
 0x210   :  { %635 = vmatpush2.msra.mxu0 %v556_v1 }
 0x211   :  { %636 = vmatprep.subr.mxu0 %v555_v2 }
 0x212   :  { %637 = vmatpush2.msra.mxu0 %v554_v3 }
 0x213   :  { %638 = vmatprep.subr.mxu0 %v553_v4 }
 0x214   :  { %639 = vmatpush2.msra.mxu0 %v552_v5 }
 0x215   :  { %640 = vmatprep.subr.mxu0 %v551_v6 }
 0x216   :  { %641 = vmatpush2.msra.mxu0 %v550_v7 }
 0x217   :  { %642 = vmatprep.subr.mxu0 %v549_v12 }
 0x218   :  { %643 = vmatpush2.msra.mxu0 %v548_v13 }
 0x219   :  { %644 = vmatprep.subr.mxu0 %v547_v14 }
 0x21a   :  { %645 = vmatpush2.msra.mxu0 %v546_v15 }
 0x21b   :  { %646 = vmatprep.subr.mxu0 %v545_v16 }
 0x21c   :  { %647 = vmatpush2.msra.mxu0 %v544_v17 }
 0x21d   :  { %648 = vmatprep.subr.mxu0 %v543_v18 }
 0x21e   :  { %649 = vmatpush2.msra.mxu0 %v542_v19 }
 0x29f   :  { %v389_v9 = vpop.f32.mrf.mxu0 }
 0x2a0   :  { %v390_v10 = vadd.f32 %v686_v8, %v389_v9 }
 0x2a1   :  { %v806_v11 = vpop.f32.mrf.mxu0 }
 0x2a2   :  { %502 = vmatmul.mubr.f32.vlgmr.msra.gmra.mxu1 %v390_v10 }
 0x362   :  { %v503_v27 = vpop.f32.mrf.mxu1 }
 0x363   :  { %v504_v28 = vadd.f32 %v503_v27, %v430_v25 }
 0x364   :  { %v505_v29 = vpop.f32.mrf.mxu1 }
 0x365   :  { %v506_v30 = vadd.f32 %v505_v29, %v434_v26  ;;  %v508_v32 = vmax.f32 %v504_v28, 0.0 }
 0x367   :  { %v509_v31 = vmax.f32 %v506_v30, 0.0 }
 0x369   :  { %650 = vmatprep.mubr.f32.mxu0 %v509_v31 }
 0x36a   :  { %651 = vmatmul.mubr.f32.vlgmr.msra.gmra.mxu0 %v508_v32 }
 0x42a   :  { %v652_v35 = vpop.f32.mrf.mxu0 }
 0x42b   :  { %v653_v36 = vadd.f32 %v652_v35, %v579_v34 }
 0x42c   :  { %v654_v39 = vpop.f32.mrf.mxu0 }
 0x42d   :  { %v658_v37 = vsel %vm657_vm2, %v653_v36, 0.0  ;;  %v655_v40 = vadd.f32 %v654_v39, %v583_v38 }
 0x42e   :  { %659 = vadd.xlane.f32.xlu0 %v658_v37 }
 0x42f   :  { %v662_v42 = vadd.f32 %v655_v40, %v653_v36 }
 0x4b7   :  { %v660_v41 = vpop.xlane.xlu0 %659 }
 0x4b8   :  { %v661_v43 = vmul.f32 0.05, %v660_v41 }
 0x4ba   :  { %v663_v44 = vsub.f32 %v662_v42, %v661_v43 }
 0x4bc   :  { %664 = vst [vmem:[#allocation13] sm:$0x3] %v663_v44 }
 0x4bd   :  { %951 = shalt.err (!%p948_p6)
}
 0x4be   :  { %674 = dma.vmem_to_hbm [thread:$0]  %s672_s13, 32, %s1142_s11, [#allocation4]  }
 0x4bf   :  { %968 = dma.done.wait [#allocation4], 32  }
 0x4c0   :  { %969 = vsyncadd [#allocation4], 4294967264 }
 0x4c1   :  { %678 = vsyncpa [#allocation3], 1 }
 0x4c2   :  { %679 = vsyncpa [#allocation6], 1 }
 0x4c3   :  { %680 = vsyncpa [#allocation9], 1 }
 0x4c4   :  { %681 = vsyncpa [#allocation12], 1 }
 0x4c5   :  { %682 = vsyncpa [#allocation4], 1 }

</bundles_post_ra>
